<compile_context>
chip_gen: v5e
topology: v5e:2x2
jax: 0.10.0
libtpu: 0.0.40
codegen_flags: <defaults>
</compile_context>

<pallas_src>
import functools

import jax
import jax.numpy as jnp
import numpy as np
from jax.experimental import pallas as pl
from jax.experimental.pallas import tpu as pltpu

H = 64          # LSTM hidden size
NUM_LAYERS = 3  # LSTM layers
D_IN = 7        # raw input feature dim
LIN = 64        # padded width of the packed linear slabs
G = 3 * H       # packed gate lanes per layer: [i | g | o] (f-gate dropped)

WEIGHT_DTYPE = jnp.float32  # bf16 is a valid v6e/v7x option (loosen test atol)


# ----------------------------------------------------------------------------
# Kernel
# ----------------------------------------------------------------------------
def network_kernel(x0_ref,      # (BP, 64)     x[:, 0, :] zero-padded to 64 lanes
                   lin_w_ref,   # (6, 64, 64)  fc1,fc2,fc3,fc4,fc5,(fc6|fc7), zero-padded, (in,out)
                   lin_b_ref,   # (6, 1, 64)   matching biases, zero-padded
                   lstm_w_ref,  # (3, 64, 192) wih^T per layer, cols [i|g|o], g pre-scaled by 2
                   lstm_b_ref,  # (3, 1, 192)  bih+bhh per layer, same layout/scaling
                   out_ref):    # (BP, 64)     cols 0/1 = delta_x/delta_y, rest zero
    h = x0_ref[...]  # (BP, 64); cols 7..63 are zero

    # ---- fc1 -> fc2 -> fc3 (ReLU). Padded weight rows/cols are zero, so the
    # padded lanes of h stay exactly 0 through the chain. ----
    for l in range(3):
        h = jnp.maximum(
            jnp.dot(h, lin_w_ref[l], preferred_element_type=jnp.float32) + lin_b_ref[l],
            0.0)

    # ---- 3-layer LSTM, single timestep (t = 0). With h0 = c0 = 0:
    #   gates = h @ wih^T + (bih + bhh)       (no h@whh^T term)
    #   c     = sigmoid(i) * tanh(g)          (f-gate irrelevant, dropped)
    #   h     = sigmoid(o) * tanh(c)
    # g columns were pre-scaled by 2, so tanh(g) = 2*sigmoid(2g) - 1 and a
    # single sigmoid over all 192 gate lanes suffices. ----
    for l in range(NUM_LAYERS):
        gates = (jnp.dot(h, lstm_w_ref[l], preferred_element_type=jnp.float32)
                 + lstm_b_ref[l])                       # (BP, 192)
        s = jax.nn.sigmoid(gates)                       # one EUP pass, all gates
        i_g = s[:, 0 * H:1 * H]
        g_g = 2.0 * s[:, 1 * H:2 * H] - 1.0             # == tanh(original g)
        o_g = s[:, 2 * H:3 * H]
        h = o_g * jnp.tanh(i_g * g_g)                   # c_prev == 0

    # ---- heads: fc4 -> fc5 (ReLU), then fused fc6|fc7 ----
    for l in range(3, 5):
        h = jnp.maximum(
            jnp.dot(h, lin_w_ref[l], preferred_element_type=jnp.float32) + lin_b_ref[l],
            0.0)
    out_ref[...] = (jnp.dot(h, lin_w_ref[5], preferred_element_type=jnp.float32)
                    + lin_b_ref[5])


# ----------------------------------------------------------------------------
# Parameter packing -- runs ONCE at init time, not in the per-call path.
# ----------------------------------------------------------------------------
def pack_params(p):
    """Pack natural (PyTorch-like) params into the slabs the kernel expects."""
    lin_w = jnp.zeros((6, LIN, LIN), jnp.float32)
    lin_b = jnp.zeros((6, 1, LIN), jnp.float32)
    for idx, name in enumerate(["1", "2", "3", "4", "5"]):
        w = p["w" + name]                      # (din, dout)
        din, dout = w.shape
        lin_w = lin_w.at[idx, :din, :dout].set(w)
        lin_b = lin_b.at[idx, 0, :dout].set(p["b" + name])
    # fused heads fc6 | fc7 -> slab index 5, columns 0 and 1
    lin_w = lin_w.at[5, :16, 0].set(p["w6"][:, 0])
    lin_w = lin_w.at[5, :16, 1].set(p["w7"][:, 0])
    lin_b = lin_b.at[5, 0, 0].set(p["b6"][0])
    lin_b = lin_b.at[5, 0, 1].set(p["b7"][0])

    # LSTM: drop the never-used f-gate columns (order i,f,g,o -> i,g,o),
    # pre-sum the two biases, and pre-scale the g columns by 2 so the kernel
    # can use tanh(g) = 2*sigmoid(2g) - 1.
    cols = jnp.concatenate([jnp.arange(0, H),          # i
                            jnp.arange(2 * H, 3 * H),  # g
                            jnp.arange(3 * H, 4 * H)]) # o
    scale = jnp.ones((G,), jnp.float32).at[H:2 * H].set(2.0)
    lstm_w = p["wih"][:, :, cols] * scale[None, None, :]                  # (3, 64, 192)
    lstm_b = ((p["bih"] + p["bhh"])[:, cols] * scale[None, :])[:, None, :]  # (3, 1, 192)

    return (lin_w.astype(WEIGHT_DTYPE), lin_b.astype(jnp.float32),
            lstm_w.astype(WEIGHT_DTYPE), lstm_b.astype(jnp.float32))


# ----------------------------------------------------------------------------
# Wrapper (jitted: pad + pallas_call + slice fuse into one executable)
# ----------------------------------------------------------------------------
@functools.partial(jax.jit, static_argnames=())
def network_forward(x, packed):
    """x: (B, T, 7) float32, packed = pack_params(p). Returns (delta_x, delta_y), each (B, 1)."""
    lin_w, lin_b, lstm_w, lstm_b = packed
    B = x.shape[0]
    BP = max(8, ((B + 7) // 8) * 8)            # sublane-aligned batch

    # Outputs depend only on timestep 0 (hidden_state[:, 0, :] of a causal,
    # zero-initialized LSTM), so only x[:, 0, :] is fed to the kernel.
    x0p = jnp.zeros((BP, LIN), WEIGHT_DTYPE).at[:B, :D_IN].set(
        x[:, 0, :].astype(WEIGHT_DTYPE))

    vmem = pl.BlockSpec(memory_space=pltpu.MemorySpace.VMEM)
    out = pl.pallas_call(
        network_kernel,
        out_shape=jax.ShapeDtypeStruct((BP, LIN), jnp.float32),
        in_specs=[vmem] * 5,
        out_specs=vmem,
    )(x0p, lin_w, lin_b, lstm_w, lstm_b)

    # NOTE: for large B on v7x, add a "parallel" batch grid axis to shard the
    # work across the two TensorCores; unnecessary at these sizes.
    return out[:B, 0:1], out[:B, 1:2]


# ----------------------------------------------------------------------------
# Deterministic parameter init (PyTorch-style uniform(-1/sqrt(fan_in), ...))
# ----------------------------------------------------------------------------
def init_params(key):
    def uni(k, shape, fan_in):
        bound = 1.0 / np.sqrt(fan_in)
        return jax.random.uniform(k, shape, jnp.float32, -bound, bound)

    keys = jax.random.split(key, 32)
    ki = iter(keys)
    p = {}
    # Linear layers: weights stored transposed (in, out), biases (out,).
    for name, (din, dout) in [("1", (7, 16)), ("2", (16, 32)), ("3", (32, 64)),
                              ("4", (64, 32)), ("5", (32, 16)),
                              ("6", (16, 1)), ("7", (16, 1))]:
        p["w" + name] = uni(next(ki), (din, dout), din)
        p["b" + name] = uni(next(ki), (dout,), din)
    # LSTM: per layer, pre-transposed to (H_in, 4H); gate order i, f, g, o.
    wih, whh, bih, bhh = [], [], [], []
    for _ in range(NUM_LAYERS):
        wih.append(uni(next(ki), (H, 4 * H), H))
        whh.append(uni(next(ki), (H, 4 * H), H))
        bih.append(uni(next(ki), (4 * H,), H))
        bhh.append(uni(next(ki), (4 * H,), H))
    p["wih"] = jnp.stack(wih)   # (3, 64, 256)
    p["whh"] = jnp.stack(whh)   # (3, 64, 256)
    p["bih"] = jnp.stack(bih)   # (3, 256)
    p["bhh"] = jnp.stack(bhh)   # (3, 256)
    return p


# ----------------------------------------------------------------------------
# Pure-JAX reference (mirrors PyTorch: full-sequence 3-layer LSTM, then t=0)
# ----------------------------------------------------------------------------
def reference_forward(x, p):
    h = jax.nn.relu(x @ p["w1"] + p["b1"])
    h = jax.nn.relu(h @ p["w2"] + p["b2"])
    h = jax.nn.relu(h @ p["w3"] + p["b3"])   # (B, T, 64)
    B, T, _ = h.shape
    seq = h
    for l in range(NUM_LAYERS):
        hs = jnp.zeros((B, H), jnp.float32)
        cs = jnp.zeros((B, H), jnp.float32)
        outs = []
        for t in range(T):
            gates = (seq[:, t, :] @ p["wih"][l] + p["bih"][l]
                     + hs @ p["whh"][l] + p["bhh"][l])
            i_g = jax.nn.sigmoid(gates[:, 0 * H:1 * H])
            f_g = jax.nn.sigmoid(gates[:, 1 * H:2 * H])
            g_g = jnp.tanh(gates[:, 2 * H:3 * H])
            o_g = jax.nn.sigmoid(gates[:, 3 * H:4 * H])
            cs = f_g * cs + i_g * g_g
            hs = o_g * jnp.tanh(cs)
            outs.append(hs)
        seq = jnp.stack(outs, axis=1)
    feature = seq[:, 0, :]
    f = jax.nn.relu(feature @ p["w4"] + p["b4"])
    f = jax.nn.relu(f @ p["w5"] + p["b5"])
    return f @ p["w6"] + p["b6"], f @ p["w7"] + p["b7"]


if __name__ == "__main__":
    key = jax.random.PRNGKey(0)
    k_param, k_x = jax.random.split(key)
    params = init_params(k_param)
    packed = pack_params(params)          # one-time packing, outside the hot path
    packed = jax.block_until_ready(packed)

    B, T = 2, 8
    x = jax.random.normal(k_x, (B, T, D_IN), jnp.float32)

    dx, dy = network_forward(x, packed)
    jax.block_until_ready((dx, dy))

    dx_ref, dy_ref = reference_forward(x, params)
    np.testing.assert_allclose(np.asarray(dx), np.asarray(dx_ref), atol=1e-4, rtol=1e-4)
    np.testing.assert_allclose(np.asarray(dy), np.asarray(dy_ref), atol=1e-4, rtol=1e-4)
    assert dx.shape == (B, 1) and dy.shape == (B, 1)

    print("KERNEL_OK")
</pallas_src>

<mosaic_0001>
module attributes {stable_mosaic.version = 11 : i64} {
  func.func @network_kernel(%arg0: memref<8x64xf32, #tpu.memory_space<vmem>>, %arg1: memref<6x64x64xf32, #tpu.memory_space<vmem>>, %arg2: memref<6x1x64xf32, #tpu.memory_space<vmem>>, %arg3: memref<3x64x192xf32, #tpu.memory_space<vmem>>, %arg4: memref<3x1x192xf32, #tpu.memory_space<vmem>>, %arg5: memref<8x64xf32, #tpu.memory_space<vmem>>) attributes {dimension_semantics = [], scalar_prefetch = 0 : i64, scratch_operands = 0 : i64, tpu.core_type = #tpu.core_type<tc>} {
    %c0 = arith.constant 0 : index
    %c0_0 = arith.constant 0 : index
    %0 = vector.load %arg0[%c0, %c0_0] : memref<8x64xf32, #tpu.memory_space<vmem>>, vector<8x64xf32>
    %c0_1 = arith.constant 0 : index
    %c0_2 = arith.constant 0 : index
    %c0_3 = arith.constant 0 : index
    %1 = vector.load %arg1[%c0_1, %c0_2, %c0_3] : memref<6x64x64xf32, #tpu.memory_space<vmem>>, vector<1x64x64xf32>
    %2 = vector.shape_cast %1 : vector<1x64x64xf32> to vector<64x64xf32>
    %cst = arith.constant dense<0.000000e+00> : vector<8x64xf32>
    %3 = tpu.matmul %0, %2, %cst {dimension_numbers = #tpu.dot_dimension_numbers<[1], [0], [0], [1], [0, 0, 1, 1], [], []>} : vector<8x64xf32>, vector<64x64xf32>, vector<8x64xf32> -> vector<8x64xf32>
    %c0_4 = arith.constant 0 : index
    %c0_5 = arith.constant 0 : index
    %c0_6 = arith.constant 0 : index
    %4 = vector.load %arg2[%c0_4, %c0_5, %c0_6] : memref<6x1x64xf32, #tpu.memory_space<vmem>>, vector<1x1x64xf32>
    %5 = vector.shape_cast %4 : vector<1x1x64xf32> to vector<1x64xf32>
    %6 = vector.broadcast %5 : vector<1x64xf32> to vector<8x64xf32>
    %7 = arith.addf %3, %6 : vector<8x64xf32>
    %cst_7 = arith.constant 0.000000e+00 : f32
    %8 = vector.broadcast %cst_7 : f32 to vector<8x64xf32>
    %9 = arith.maximumf %7, %8 : vector<8x64xf32>
    %c1 = arith.constant 1 : index
    %c0_8 = arith.constant 0 : index
    %c0_9 = arith.constant 0 : index
    %10 = vector.load %arg1[%c1, %c0_8, %c0_9] : memref<6x64x64xf32, #tpu.memory_space<vmem>>, vector<1x64x64xf32>
    %11 = vector.shape_cast %10 : vector<1x64x64xf32> to vector<64x64xf32>
    %cst_10 = arith.constant dense<0.000000e+00> : vector<8x64xf32>
    %12 = tpu.matmul %9, %11, %cst_10 {dimension_numbers = #tpu.dot_dimension_numbers<[1], [0], [0], [1], [0, 0, 1, 1], [], []>} : vector<8x64xf32>, vector<64x64xf32>, vector<8x64xf32> -> vector<8x64xf32>
    %c1_11 = arith.constant 1 : index
    %c0_12 = arith.constant 0 : index
    %c0_13 = arith.constant 0 : index
    %13 = vector.load %arg2[%c1_11, %c0_12, %c0_13] : memref<6x1x64xf32, #tpu.memory_space<vmem>>, vector<1x1x64xf32>
    %14 = vector.shape_cast %13 : vector<1x1x64xf32> to vector<1x64xf32>
    %15 = vector.broadcast %14 : vector<1x64xf32> to vector<8x64xf32>
    %16 = arith.addf %12, %15 : vector<8x64xf32>
    %cst_14 = arith.constant 0.000000e+00 : f32
    %17 = vector.broadcast %cst_14 : f32 to vector<8x64xf32>
    %18 = arith.maximumf %16, %17 : vector<8x64xf32>
    %c2 = arith.constant 2 : index
    %c0_15 = arith.constant 0 : index
    %c0_16 = arith.constant 0 : index
    %19 = vector.load %arg1[%c2, %c0_15, %c0_16] : memref<6x64x64xf32, #tpu.memory_space<vmem>>, vector<1x64x64xf32>
    %20 = vector.shape_cast %19 : vector<1x64x64xf32> to vector<64x64xf32>
    %cst_17 = arith.constant dense<0.000000e+00> : vector<8x64xf32>
    %21 = tpu.matmul %18, %20, %cst_17 {dimension_numbers = #tpu.dot_dimension_numbers<[1], [0], [0], [1], [0, 0, 1, 1], [], []>} : vector<8x64xf32>, vector<64x64xf32>, vector<8x64xf32> -> vector<8x64xf32>
    %c2_18 = arith.constant 2 : index
    %c0_19 = arith.constant 0 : index
    %c0_20 = arith.constant 0 : index
    %22 = vector.load %arg2[%c2_18, %c0_19, %c0_20] : memref<6x1x64xf32, #tpu.memory_space<vmem>>, vector<1x1x64xf32>
    %23 = vector.shape_cast %22 : vector<1x1x64xf32> to vector<1x64xf32>
    %24 = vector.broadcast %23 : vector<1x64xf32> to vector<8x64xf32>
    %25 = arith.addf %21, %24 : vector<8x64xf32>
    %cst_21 = arith.constant 0.000000e+00 : f32
    %26 = vector.broadcast %cst_21 : f32 to vector<8x64xf32>
    %27 = arith.maximumf %25, %26 : vector<8x64xf32>
    %c0_22 = arith.constant 0 : index
    %c0_23 = arith.constant 0 : index
    %c0_24 = arith.constant 0 : index
    %28 = vector.load %arg3[%c0_22, %c0_23, %c0_24] : memref<3x64x192xf32, #tpu.memory_space<vmem>>, vector<1x64x192xf32>
    %29 = vector.shape_cast %28 : vector<1x64x192xf32> to vector<64x192xf32>
    %cst_25 = arith.constant dense<0.000000e+00> : vector<8x192xf32>
    %30 = tpu.matmul %27, %29, %cst_25 {dimension_numbers = #tpu.dot_dimension_numbers<[1], [0], [0], [1], [0, 0, 1, 1], [], []>} : vector<8x64xf32>, vector<64x192xf32>, vector<8x192xf32> -> vector<8x192xf32>
    %c0_26 = arith.constant 0 : index
    %c0_27 = arith.constant 0 : index
    %c0_28 = arith.constant 0 : index
    %31 = vector.load %arg4[%c0_26, %c0_27, %c0_28] : memref<3x1x192xf32, #tpu.memory_space<vmem>>, vector<1x1x192xf32>
    %32 = vector.shape_cast %31 : vector<1x1x192xf32> to vector<1x192xf32>
    %33 = vector.broadcast %32 : vector<1x192xf32> to vector<8x192xf32>
    %34 = arith.addf %30, %33 : vector<8x192xf32>
    %35 = arith.negf %34 : vector<8x192xf32>
    %36 = math.exp %35 : vector<8x192xf32>
    %cst_29 = arith.constant 1.000000e+00 : f32
    %37 = vector.broadcast %cst_29 : f32 to vector<8x192xf32>
    %38 = arith.addf %37, %36 : vector<8x192xf32>
    %39 = arith.divf %37, %38 : vector<8x192xf32>
    %40 = vector.extract_strided_slice %39 {offsets = [0, 0], sizes = [8, 64], strides = [1, 1]} : vector<8x192xf32> to vector<8x64xf32>
    %41 = vector.extract_strided_slice %39 {offsets = [0, 64], sizes = [8, 64], strides = [1, 1]} : vector<8x192xf32> to vector<8x64xf32>
    %cst_30 = arith.constant 2.000000e+00 : f32
    %42 = vector.broadcast %cst_30 : f32 to vector<8x64xf32>
    %43 = arith.mulf %42, %41 : vector<8x64xf32>
    %cst_31 = arith.constant 1.000000e+00 : f32
    %44 = vector.broadcast %cst_31 : f32 to vector<8x64xf32>
    %45 = arith.subf %43, %44 : vector<8x64xf32>
    %46 = vector.extract_strided_slice %39 {offsets = [0, 128], sizes = [8, 64], strides = [1, 1]} : vector<8x192xf32> to vector<8x64xf32>
    %47 = arith.mulf %40, %45 : vector<8x64xf32>
    %48 = math.tanh %47 : vector<8x64xf32>
    %49 = arith.mulf %46, %48 : vector<8x64xf32>
    %c1_32 = arith.constant 1 : index
    %c0_33 = arith.constant 0 : index
    %c0_34 = arith.constant 0 : index
    %50 = vector.load %arg3[%c1_32, %c0_33, %c0_34] : memref<3x64x192xf32, #tpu.memory_space<vmem>>, vector<1x64x192xf32>
    %51 = vector.shape_cast %50 : vector<1x64x192xf32> to vector<64x192xf32>
    %cst_35 = arith.constant dense<0.000000e+00> : vector<8x192xf32>
    %52 = tpu.matmul %49, %51, %cst_35 {dimension_numbers = #tpu.dot_dimension_numbers<[1], [0], [0], [1], [0, 0, 1, 1], [], []>} : vector<8x64xf32>, vector<64x192xf32>, vector<8x192xf32> -> vector<8x192xf32>
    %c1_36 = arith.constant 1 : index
    %c0_37 = arith.constant 0 : index
    %c0_38 = arith.constant 0 : index
    %53 = vector.load %arg4[%c1_36, %c0_37, %c0_38] : memref<3x1x192xf32, #tpu.memory_space<vmem>>, vector<1x1x192xf32>
    %54 = vector.shape_cast %53 : vector<1x1x192xf32> to vector<1x192xf32>
    %55 = vector.broadcast %54 : vector<1x192xf32> to vector<8x192xf32>
    %56 = arith.addf %52, %55 : vector<8x192xf32>
    %57 = arith.negf %56 : vector<8x192xf32>
    %58 = math.exp %57 : vector<8x192xf32>
    %cst_39 = arith.constant 1.000000e+00 : f32
    %59 = vector.broadcast %cst_39 : f32 to vector<8x192xf32>
    %60 = arith.addf %59, %58 : vector<8x192xf32>
    %61 = arith.divf %59, %60 : vector<8x192xf32>
    %62 = vector.extract_strided_slice %61 {offsets = [0, 0], sizes = [8, 64], strides = [1, 1]} : vector<8x192xf32> to vector<8x64xf32>
    %63 = vector.extract_strided_slice %61 {offsets = [0, 64], sizes = [8, 64], strides = [1, 1]} : vector<8x192xf32> to vector<8x64xf32>
    %cst_40 = arith.constant 2.000000e+00 : f32
    %64 = vector.broadcast %cst_40 : f32 to vector<8x64xf32>
    %65 = arith.mulf %64, %63 : vector<8x64xf32>
    %cst_41 = arith.constant 1.000000e+00 : f32
    %66 = vector.broadcast %cst_41 : f32 to vector<8x64xf32>
    %67 = arith.subf %65, %66 : vector<8x64xf32>
    %68 = vector.extract_strided_slice %61 {offsets = [0, 128], sizes = [8, 64], strides = [1, 1]} : vector<8x192xf32> to vector<8x64xf32>
    %69 = arith.mulf %62, %67 : vector<8x64xf32>
    %70 = math.tanh %69 : vector<8x64xf32>
    %71 = arith.mulf %68, %70 : vector<8x64xf32>
    %c2_42 = arith.constant 2 : index
    %c0_43 = arith.constant 0 : index
    %c0_44 = arith.constant 0 : index
    %72 = vector.load %arg3[%c2_42, %c0_43, %c0_44] : memref<3x64x192xf32, #tpu.memory_space<vmem>>, vector<1x64x192xf32>
    %73 = vector.shape_cast %72 : vector<1x64x192xf32> to vector<64x192xf32>
    %cst_45 = arith.constant dense<0.000000e+00> : vector<8x192xf32>
    %74 = tpu.matmul %71, %73, %cst_45 {dimension_numbers = #tpu.dot_dimension_numbers<[1], [0], [0], [1], [0, 0, 1, 1], [], []>} : vector<8x64xf32>, vector<64x192xf32>, vector<8x192xf32> -> vector<8x192xf32>
    %c2_46 = arith.constant 2 : index
    %c0_47 = arith.constant 0 : index
    %c0_48 = arith.constant 0 : index
    %75 = vector.load %arg4[%c2_46, %c0_47, %c0_48] : memref<3x1x192xf32, #tpu.memory_space<vmem>>, vector<1x1x192xf32>
    %76 = vector.shape_cast %75 : vector<1x1x192xf32> to vector<1x192xf32>
    %77 = vector.broadcast %76 : vector<1x192xf32> to vector<8x192xf32>
    %78 = arith.addf %74, %77 : vector<8x192xf32>
    %79 = arith.negf %78 : vector<8x192xf32>
    %80 = math.exp %79 : vector<8x192xf32>
    %cst_49 = arith.constant 1.000000e+00 : f32
    %81 = vector.broadcast %cst_49 : f32 to vector<8x192xf32>
    %82 = arith.addf %81, %80 : vector<8x192xf32>
    %83 = arith.divf %81, %82 : vector<8x192xf32>
    %84 = vector.extract_strided_slice %83 {offsets = [0, 0], sizes = [8, 64], strides = [1, 1]} : vector<8x192xf32> to vector<8x64xf32>
    %85 = vector.extract_strided_slice %83 {offsets = [0, 64], sizes = [8, 64], strides = [1, 1]} : vector<8x192xf32> to vector<8x64xf32>
    %cst_50 = arith.constant 2.000000e+00 : f32
    %86 = vector.broadcast %cst_50 : f32 to vector<8x64xf32>
    %87 = arith.mulf %86, %85 : vector<8x64xf32>
    %cst_51 = arith.constant 1.000000e+00 : f32
    %88 = vector.broadcast %cst_51 : f32 to vector<8x64xf32>
    %89 = arith.subf %87, %88 : vector<8x64xf32>
    %90 = vector.extract_strided_slice %83 {offsets = [0, 128], sizes = [8, 64], strides = [1, 1]} : vector<8x192xf32> to vector<8x64xf32>
    %91 = arith.mulf %84, %89 : vector<8x64xf32>
    %92 = math.tanh %91 : vector<8x64xf32>
    %93 = arith.mulf %90, %92 : vector<8x64xf32>
    %c3 = arith.constant 3 : index
    %c0_52 = arith.constant 0 : index
    %c0_53 = arith.constant 0 : index
    %94 = vector.load %arg1[%c3, %c0_52, %c0_53] : memref<6x64x64xf32, #tpu.memory_space<vmem>>, vector<1x64x64xf32>
    %95 = vector.shape_cast %94 : vector<1x64x64xf32> to vector<64x64xf32>
    %cst_54 = arith.constant dense<0.000000e+00> : vector<8x64xf32>
    %96 = tpu.matmul %93, %95, %cst_54 {dimension_numbers = #tpu.dot_dimension_numbers<[1], [0], [0], [1], [0, 0, 1, 1], [], []>} : vector<8x64xf32>, vector<64x64xf32>, vector<8x64xf32> -> vector<8x64xf32>
    %c3_55 = arith.constant 3 : index
    %c0_56 = arith.constant 0 : index
    %c0_57 = arith.constant 0 : index
    %97 = vector.load %arg2[%c3_55, %c0_56, %c0_57] : memref<6x1x64xf32, #tpu.memory_space<vmem>>, vector<1x1x64xf32>
    %98 = vector.shape_cast %97 : vector<1x1x64xf32> to vector<1x64xf32>
    %99 = vector.broadcast %98 : vector<1x64xf32> to vector<8x64xf32>
    %100 = arith.addf %96, %99 : vector<8x64xf32>
    %cst_58 = arith.constant 0.000000e+00 : f32
    %101 = vector.broadcast %cst_58 : f32 to vector<8x64xf32>
    %102 = arith.maximumf %100, %101 : vector<8x64xf32>
    %c4 = arith.constant 4 : index
    %c0_59 = arith.constant 0 : index
    %c0_60 = arith.constant 0 : index
    %103 = vector.load %arg1[%c4, %c0_59, %c0_60] : memref<6x64x64xf32, #tpu.memory_space<vmem>>, vector<1x64x64xf32>
    %104 = vector.shape_cast %103 : vector<1x64x64xf32> to vector<64x64xf32>
    %cst_61 = arith.constant dense<0.000000e+00> : vector<8x64xf32>
    %105 = tpu.matmul %102, %104, %cst_61 {dimension_numbers = #tpu.dot_dimension_numbers<[1], [0], [0], [1], [0, 0, 1, 1], [], []>} : vector<8x64xf32>, vector<64x64xf32>, vector<8x64xf32> -> vector<8x64xf32>
    %c4_62 = arith.constant 4 : index
    %c0_63 = arith.constant 0 : index
    %c0_64 = arith.constant 0 : index
    %106 = vector.load %arg2[%c4_62, %c0_63, %c0_64] : memref<6x1x64xf32, #tpu.memory_space<vmem>>, vector<1x1x64xf32>
    %107 = vector.shape_cast %106 : vector<1x1x64xf32> to vector<1x64xf32>
    %108 = vector.broadcast %107 : vector<1x64xf32> to vector<8x64xf32>
    %109 = arith.addf %105, %108 : vector<8x64xf32>
    %cst_65 = arith.constant 0.000000e+00 : f32
    %110 = vector.broadcast %cst_65 : f32 to vector<8x64xf32>
    %111 = arith.maximumf %109, %110 : vector<8x64xf32>
    %c5 = arith.constant 5 : index
    %c0_66 = arith.constant 0 : index
    %c0_67 = arith.constant 0 : index
    %112 = vector.load %arg1[%c5, %c0_66, %c0_67] : memref<6x64x64xf32, #tpu.memory_space<vmem>>, vector<1x64x64xf32>
    %113 = vector.shape_cast %112 : vector<1x64x64xf32> to vector<64x64xf32>
    %cst_68 = arith.constant dense<0.000000e+00> : vector<8x64xf32>
    %114 = tpu.matmul %111, %113, %cst_68 {dimension_numbers = #tpu.dot_dimension_numbers<[1], [0], [0], [1], [0, 0, 1, 1], [], []>} : vector<8x64xf32>, vector<64x64xf32>, vector<8x64xf32> -> vector<8x64xf32>
    %c5_69 = arith.constant 5 : index
    %c0_70 = arith.constant 0 : index
    %c0_71 = arith.constant 0 : index
    %115 = vector.load %arg2[%c5_69, %c0_70, %c0_71] : memref<6x1x64xf32, #tpu.memory_space<vmem>>, vector<1x1x64xf32>
    %116 = vector.shape_cast %115 : vector<1x1x64xf32> to vector<1x64xf32>
    %117 = vector.broadcast %116 : vector<1x64xf32> to vector<8x64xf32>
    %118 = arith.addf %114, %117 : vector<8x64xf32>
    %c0_72 = arith.constant 0 : index
    %c0_73 = arith.constant 0 : index
    %119 = vector.load %arg5[%c0_72, %c0_73] : memref<8x64xf32, #tpu.memory_space<vmem>>, vector<8x64xf32>
    tpu.vector_store %arg5[%c0_72, %c0_73], %118 {strides = array<i32>} : memref<8x64xf32, #tpu.memory_space<vmem>>, vector<8x64xf32>,
    return
  }
}

</mosaic_0001>

<bundles_post_ra>
// kernel: network_forward.1
= control target key start
LH: loop header
LB: loop body
LE: loop exit
PB: predicated region body
PF: predicated region fallthrough
CT: control target
= control target key end

     0   :  { %10 = vsyncpa [#allocation3], 0  ;;  %s841_s0 = inlined_call_operand.vmem [shape: f32[8,64], index: 0, kind: input, shape index: {}]   ;;  %s842_s1 = inlined_call_operand.hbm [shape: f32[6,64,64], index: 1, kind: input, shape index: {}]   ;;  %s843_s2 = inlined_call_operand.vmem [shape: f32[6,1,64], index: 2, kind: input, shape index: {}]   ;;  %s844_s3 = inlined_call_operand.hbm [shape: f32[3,64,192], index: 3, kind: input, shape index: {}]   ;;  %s845_s4 = inlined_call_operand.vmem [shape: f32[3,1,192], index: 4, kind: input, shape index: {}]   ;;  %s846_s5 = inlined_call_operand.vmem [shape: f32[8,64], index: 5, kind: output, shape index: {}]  }
   0x1   :  { %s18_s20 = sshll.u32 %s842_s1, 4  ;;  %s19_s20 = int_to_ptr.hbm [resolvable:$true] %s18_s20 }
   0x2   :  { %11 = vsyncpa [#allocation5], 0  ;;  %s749_s21 = smov [#allocation2]   ;;  %s33_s25 = sshll.u32 %s844_s3, 4  ;;  %s34_s25 = int_to_ptr.hbm [resolvable:$true] %s33_s25 }
   0x3   :  { %s20_s22 = sshll.u32 %s749_s21, 4  ;;  %s750_s26 = smov 128   ;;  %s21_s22 = int_to_ptr.vmem [resolvable:$true] %s20_s22 }
   0x4   :  { %s751_s27 = smov 8   ;;  %s752_s28 = smov [#allocation4]  }
   0x5   :  { %26 = dma.hbm_to_vmem [thread:$0]  %s19_s20, 6144, %s21_s22, [#allocation3], %s750_s26, %s750_s26, %s751_s27  }
   0x6   :  { %s35_s29 = sshll.u32 %s752_s28, 4  ;;  %s753_s30 = smov 256   ;;  %s36_s29 = int_to_ptr.vmem [resolvable:$true] %s35_s29 }
   0x7   :  { %s754_s6 = smov 16  }
   0x8   :  { %41 = dma.hbm_to_vmem [thread:$0]  %s34_s25, 6144, %s36_s29, [#allocation5], %s753_s30, %s753_s30, %s754_s6  }
   0x9   :  { %745 = dma.done.wait [#allocation3], 6144  }
   0xa   :  { %746 = vsyncadd [#allocation3], 4294961152 }
   0xb   :  { %747 = dma.done.wait [#allocation5], 6144  }
   0xc   :  { %748 = vsyncadd [#allocation5], 4294961152  ;;  %v60_v0 = vld [vmem:[#allocation2 + $0x38] sm:$0xff]  ;;  %v59_v1 = vld [vmem:[#allocation2 + $0x30] sm:$0xff]  ;;  %vm65_vm0 = vcmask 523264   ;;  %s755_s14 = smov 64  }
   0xd   :  { %77 = vmatpush.msra.mxu0 %v60_v0  ;;  %v58_v2 = vld [vmem:[#allocation2 + $0x28] sm:$0xff]  ;;  %v98_v3 = vld [vmem:[#allocation2 + $0x78] sm:$0xff]  ;;  %v97_v4 = vld [vmem:[#allocation2 + $0x70] sm:$0xff] }
   0xe   :  { %v57_v5 = vld [vmem:[#allocation2 + $0x20] sm:$0xff]  ;;  %v56_v6 = vld [vmem:[#allocation2 + $0x18] sm:$0xff]  ;;  %115 = vmatpush.msra.mxu1 %v98_v3  ;;  %v96_v7 = vld [vmem:[#allocation2 + $0x68] sm:$0xff] }
   0xf   :  { %78 = vmatpush.msra.mxu0 %v59_v1  ;;  %v95_v8 = vld [vmem:[#allocation2 + $0x60] sm:$0xff]  ;;  %v55_v9 = vld [vmem:[#allocation2 + $0x10] sm:$0xff]  ;;  %v94_v10 = vld [vmem:[#allocation2 + $0x58] sm:$0xff] }
  0x10   :  { %116 = vmatpush.msra.mxu1 %v97_v4  ;;  %v54_v11 = vld [vmem:[#allocation2 + $0x8] sm:$0xff]  ;;  %v53_v12 = vld [vmem:[#allocation2] sm:$0xff]  ;;  %v93_v14 = vld [vmem:[#allocation2 + $0x50] sm:$0xff] }
  0x11   :  { %79 = vmatpush.msra.mxu0 %v58_v2  ;;  %v52_v13 = vld [vmem:[%s841_s0] sm:$0xff]  ;;  %v92_v15 = vld [vmem:[#allocation2 + $0x48] sm:$0xff]  ;;  %v136_v17 = vld [vmem:[#allocation2 + $0xb8] sm:$0xff] }
  0x12   :  { %117 = vmatpush.msra.mxu1 %v96_v7  ;;  %v91_v16 = vld [vmem:[#allocation2 + $0x40] sm:$0xff]  ;;  %v135_v18 = vld [vmem:[#allocation2 + $0xb0] sm:$0xff]  ;;  %153 = vmatpush.msra.mxu2 %v136_v17  ;;  %v134_v19 = vld [vmem:[#allocation2 + $0xa8] sm:$0xff] }
  0x13   :  { %80 = vmatpush.msra.mxu0 %v57_v5  ;;  %v133_v20 = vld [vmem:[#allocation2 + $0xa0] sm:$0xff]  ;;  %v132_v21 = vld [vmem:[#allocation2 + $0x98] sm:$0xff]  ;;  %v131_v26 = vld [vmem:[#allocation2 + $0x90] sm:$0xff] }
  0x14   :  { %118 = vmatpush.msra.mxu1 %v95_v8  ;;  %154 = vmatpush.msra.mxu2 %v135_v18  ;;  %v661_v22 = vld [vmem:[%s843_s2] ss:$0 sm:$0xff]  ;;  %v130_v27 = vld [vmem:[#allocation2 + $0x88] sm:$0xff]  ;;  %v180_v29 = vld [vmem:[#allocation4 + $0x70] sm:$0xff] }
  0x15   :  { %81 = vmatpush.msra.mxu0 %v56_v6  ;;  %v129_v28 = vld [vmem:[#allocation2 + $0x80] sm:$0xff]  ;;  %v181_v30 = vld [vmem:[#allocation4 + $0x78] sm:$0xff]  ;;  %199 = vmatpush.msra.mxu3 %v180_v29  ;;  %v179_v32 = vld [vmem:[#allocation4 + $0x68] sm:$0xff] }
  0x16   :  { %119 = vmatpush.msra.mxu1 %v94_v10  ;;  %155 = vmatpush.msra.mxu2 %v134_v19  ;;  %v178_v31 = vld [vmem:[#allocation4 + $0x60] sm:$0xff]  ;;  %v176_v33 = vld [vmem:[#allocation4 + $0x50] sm:$0xff]  ;;  %v177_v34 = vld [vmem:[#allocation4 + $0x58] sm:$0xff] }
  0x17   :  { %82 = vmatpush.msra.mxu0 %v55_v9  ;;  %200 = vmatpush.msra.mxu3 %v178_v31  ;;  %v174_v35 = vld [vmem:[#allocation4 + $0x40] sm:$0xff]  ;;  %v175_v36 = vld [vmem:[#allocation4 + $0x48] sm:$0xff]  ;;  %v172_v37 = vld [vmem:[#allocation4 + $0x30] sm:$0xff] }
  0x18   :  { %120 = vmatpush.msra.mxu1 %v93_v14  ;;  %156 = vmatpush.msra.mxu2 %v133_v20  ;;  %v173_v38 = vld [vmem:[#allocation4 + $0x38] sm:$0xff]  ;;  %v662_v39 = vld [vmem:[%s843_s2 + $0x1] ss:$0 sm:$0xff]  ;;  %v171_v44 = vld [vmem:[#allocation4 + $0x28] sm:$0xff] }
  0x19   :  { %83 = vmatpush.msra.mxu0 %v54_v11  ;;  %201 = vmatpush.msra.mxu3 %v176_v33  ;;  %v170_v43 = vld [vmem:[#allocation4 + $0x20] sm:$0xff]  ;;  %v168_v45 = vld [vmem:[#allocation4 + $0x10] sm:$0xff]  ;;  %v169_v46 = vld [vmem:[#allocation4 + $0x18] sm:$0xff] }
  0x1a   :  { %121 = vmatpush.msra.mxu1 %v92_v15  ;;  %157 = vmatpush.msra.mxu2 %v132_v21  ;;  %v166_v47 = vld [vmem:[#allocation4] sm:$0xff]  ;;  %v167_v48 = vld [vmem:[#allocation4 + $0x8] sm:$0xff]  ;;  %v293_v58 = vld [vmem:[#allocation4 + $0xf0] sm:$0xff] }
  0x1b   :  { %84 = vmatpush.msra.mxu0 %v53_v12  ;;  %202 = vmatpush.msra.mxu3 %v174_v35  ;;  %v663_v49 = vld [vmem:[%s843_s2 + $0x2] ss:$0 sm:$0xff]  ;;  %v182_v53 = vld [vmem:[%s845_s4] sm:$0x3]  ;;  %v294_v59 = vld [vmem:[#allocation4 + $0xf8] sm:$0xff] }
  0x1c   :  { %626 = vmatmul.msk.f32.vlgmr.msra.gmra.mxu0 %vm65_vm0, %v52_v13  ;;  %122 = vmatpush.msra.mxu1 %v91_v16  ;;  %v184_v54 = vperm.slane %v182_v53, 0  ;;  %v291_v60 = vld [vmem:[#allocation4 + $0xe0] sm:$0xff]  ;;  %v292_v61 = vld [vmem:[#allocation4 + $0xe8] sm:$0xff]  ;;  %v185_v12 = vperm.slane %v182_v53, 1  ;;  %v289_v16 = vld [vmem:[#allocation4 + $0xd0] sm:$0xff] }
  0x1d   :  { %158 = vmatpush.msra.mxu2 %v131_v26  ;;  %219 = vmatpush.msrb.mxu0 %v181_v30  ;;  %v290_v17 = vld [vmem:[#allocation4 + $0xd8] sm:$0xff]  ;;  %v287_v18 = vld [vmem:[#allocation4 + $0xc0] sm:$0xff]  ;;  %v288_v19 = vld [vmem:[#allocation4 + $0xc8] sm:$0xff] }
  0x1e   :  { %203 = vmatpush.msra.mxu3 %v172_v37  ;;  %313 = vmatpush.msrb.mxu1 %v293_v58  ;;  %v285_v20 = vld [vmem:[#allocation4 + $0xb0] sm:$0xff]  ;;  %v286_v21 = vld [vmem:[#allocation4 + $0xb8] sm:$0xff] }
  0x1f   :  { %159 = vmatpush.msra.mxu2 %v130_v27  ;;  %220 = vmatpush.msrb.mxu0 %v179_v32  ;;  %v282_v26 = vld [vmem:[#allocation4 + $0x98] sm:$0xff]  ;;  %v279_v27 = vld [vmem:[#allocation4 + $0x80] sm:$0xff] }
  0x20   :  { %204 = vmatpush.msra.mxu3 %v170_v43  ;;  %314 = vmatpush.msrb.mxu1 %v291_v60 }
  0x21   :  { %160 = vmatpush.msra.mxu2 %v129_v28  ;;  %221 = vmatpush.msrb.mxu0 %v177_v34  ;;  %v280_v28 = vld [vmem:[#allocation4 + $0x88] sm:$0xff] }
  0x22   :  { %205 = vmatpush.msra.mxu3 %v168_v45  ;;  %315 = vmatpush.msrb.mxu1 %v289_v16  ;;  %v395_v16 = vld [vmem:[#allocation4 + $0x110] sm:$0xff] }
  0x23   :  { %222 = vmatpush.msrb.mxu0 %v175_v36  ;;  %333 = vmatpush.msrb.mxu2 %v294_v59 }
  0x24   :  { %206 = vmatpush.msra.mxu3 %v166_v47  ;;  %316 = vmatpush.msrb.mxu1 %v287_v18  ;;  %v393_v18 = vld [vmem:[#allocation4 + $0x100] sm:$0xff] }
  0x25   :  { %223 = vmatpush.msrb.mxu0 %v173_v38  ;;  %334 = vmatpush.msrb.mxu2 %v292_v61 }
  0x26   :  { %317 = vmatpush.msrb.mxu1 %v285_v20 }
  0x27   :  { %224 = vmatpush.msrb.mxu0 %v171_v44  ;;  %335 = vmatpush.msrb.mxu2 %v290_v17  ;;  %v636_v44 = vld [vmem:[%s845_s4 + $0x2] sm:$0x3]  ;;  %v396_v17 = vld [vmem:[#allocation4 + $0x118] sm:$0xff] }
  0x28   :  { %v298_v45 = vperm.slane %v636_v44, 0 }
  0x29   :  { %225 = vmatpush.msrb.mxu0 %v169_v46  ;;  %336 = vmatpush.msrb.mxu2 %v288_v19  ;;  %v394_v19 = vld [vmem:[#allocation4 + $0x108] sm:$0xff] }
  0x2b   :  { %226 = vmatpush.msrb.mxu0 %v167_v48  ;;  %337 = vmatpush.msrb.mxu2 %v286_v21 }
  0x99   :  { %v86_v23 = vpop.f32.mrf.mxu0 }
  0x9a   :  { %v87_v24 = vadd.f32 %v661_v22, %v86_v23  ;;  %v283_v22 = vld [vmem:[#allocation4 + $0xa0] sm:$0xff]  ;;  %v284_v23 = vld [vmem:[#allocation4 + $0xa8] sm:$0xff] }
  0x9b   :  { %318 = vmatpush.msrb.mxu1 %v283_v22  ;;  %338 = vmatpush.msrb.mxu2 %v284_v23 }
  0x9c   :  { %v89_v25 = vmax.f32 %v87_v24, 0.0 }
  0x9d   :  { %339 = vmatpush.msrb.mxu2 %v282_v26 }
  0x9e   :  { %628 = vmatmul.msk.f32.vlgmr.msra.gmra.mxu1 %vm65_vm0, %v89_v25  ;;  %v281_v25 = vld [vmem:[#allocation4 + $0x90] sm:$0xff] }
  0x9f   :  { %319 = vmatpush.msrb.mxu1 %v281_v25  ;;  %340 = vmatpush.msrb.mxu2 %v280_v28 }
  0xa1   :  { %320 = vmatpush.msrb.mxu1 %v279_v27 }
 0x11b   :  { %v124_v40 = vpop.f32.mrf.mxu1 }
 0x11c   :  { %v125_v41 = vadd.f32 %v662_v39, %v124_v40 }
 0x11e   :  { %v127_v42 = vmax.f32 %v125_v41, 0.0 }
 0x120   :  { %630 = vmatmul.msk.f32.vlgmr.msra.gmra.mxu2 %vm65_vm0, %v127_v42 }
 0x1a3   :  { %v162_v50 = vpop.f32.mrf.mxu2 }
 0x1a4   :  { %v163_v51 = vadd.f32 %v663_v49, %v162_v50  ;;  %v407_v49 = vld [vmem:[#allocation4 + $0x170] sm:$0xff]  ;;  %v408_v50 = vld [vmem:[#allocation4 + $0x178] sm:$0xff] }
 0x1a5   :  { %427 = vmatpush.msrb.mxu3 %v407_v49  ;;  %447 = vmatpush.msra.mxu0 %v408_v50 }
 0x1a6   :  { %v165_v52 = vmax.f32 %v163_v51, 0.0  ;;  %v405_v51 = vld [vmem:[#allocation4 + $0x160] sm:$0xff] }
 0x1a7   :  { %428 = vmatpush.msrb.mxu3 %v405_v51 }
 0x1a8   :  { %631 = vmatmul.msk.f32.vlgmr.msra.gmra.mxu3 %vm65_vm0, %v165_v52  ;;  %632 = vmatmul.msk.f32.vlgmr.msrb.gmra.mxu0 %vm65_vm0, %v165_v52  ;;  %v406_v52 = vld [vmem:[#allocation4 + $0x168] sm:$0xff] }
 0x1a9   :  { %448 = vmatpush.msra.mxu0 %v406_v52 }
 0x225   :  { %v228_v13 = vpop.f32.mrf.mxu0 }
 0x226   :  { %v229_v14 = vadd.f32 %v228_v13, %v185_v12  ;;  %v400_v12 = vld [vmem:[#allocation4 + $0x138] sm:$0xff]  ;;  %v397_v13 = vld [vmem:[#allocation4 + $0x120] sm:$0xff] }
 0x228   :  { %v634_v15 = vmul.f32 -1.442695, %v229_v14  ;;  %v398_v14 = vld [vmem:[#allocation4 + $0x128] sm:$0xff] }
 0x22b   :  { %v208_v55 = vpop.f32.mrf.mxu3 }
 0x22c   :  { %v209_v56 = vadd.f32 %v208_v55, %v184_v54 }
 0x22e   :  { %v633_v57 = vmul.f32 -1.442695, %v209_v56 }
 0x230   :  { %667 = vpow2.f32 %v633_v57 }
 0x236   :  { %v668_v62 = vpop.eup %667 }
 0x237   :  { %v237_v63 = vadd.f32 1.0, %v668_v62 }
 0x239   :  { %669 = vrcp.f32 %v237_v63  ;;  %v250_v3 = vand.u32 2147483648, %v237_v63  ;;  %v248_v5 = vand.u32 2147483647, %v237_v63  ;;  %vm244_vm2 = vweird.f32 %v237_v63 }
 0x23a   :  { %671 = vpow2.f32 %v634_v15 }
 0x23b   :  { %v251_v7 = vor.u32 1.1754944e-38, %v250_v3  ;;  %vm249_vm4 = vcmp.eq.f32.partialorder %v248_v5, 8.507059e+37  ;;  %v299_v3 = vperm.slane %v636_v44, 1 }
 0x23f   :  { %v670_v0 = vpop.eup %669 }
 0x240   :  { %v240_v1 = vmul.f32 %v670_v0, %v237_v63  ;;  %vm245_vm1 = vweird.f32 %v670_v0  ;;  %v672_v24 = vpop.eup %671 }
 0x241   :  { %vm246_vm3 = vmor %vm244_vm2, %vm245_vm1  ;;  %v238_v29 = vadd.f32 1.0, %v672_v24 }
 0x242   :  { %v241_v2 = vsub.f32 1.0, %v240_v1 }
 0x243   :  { %673 = vrcp.f32 %v238_v29  ;;  %v265_v37 = vand.u32 2147483648, %v238_v29  ;;  %vm259_vm6 = vweird.f32 %v238_v29  ;;  %v263_v38 = vand.u32 2147483647, %v238_v29 }
 0x244   :  { %v242_v4 = vmul.f32 %v670_v0, %v241_v2 }
 0x245   :  { %v266_v40 = vor.u32 1.1754944e-38, %v265_v37  ;;  %vm264_vm8 = vcmp.eq.f32.partialorder %v263_v38, 8.507059e+37 }
 0x246   :  { %v243_v6 = vadd.f32 %v670_v0, %v242_v4 }
 0x248   :  { %v247_v8 = vsel %vm246_vm3, %v670_v0, %v243_v6 }
 0x249   :  { %v252_v9 = vsel %vm249_vm4, %v251_v7, %v247_v8  ;;  %v674_v30 = vpop.eup %673  ;;  %v403_v7 = vld [vmem:[#allocation4 + $0x150] sm:$0xff]  ;;  %v404_v8 = vld [vmem:[#allocation4 + $0x158] sm:$0xff] }
 0x24a   :  { %v269_v10 = vmul.f32 2.0, %v252_v9  ;;  %v255_v31 = vmul.f32 %v674_v30, %v238_v29  ;;  %vm260_vm5 = vweird.f32 %v674_v30  ;;  %429 = vmatpush.msrb.mxu3 %v403_v7  ;;  %449 = vmatpush.msra.mxu0 %v404_v8  ;;  %v549_v7 = vld [vmem:[#allocation2 + $0x120] sm:$0xff]  ;;  %v548_v8 = vld [vmem:[#allocation2 + $0x118] sm:$0xff] }
 0x24b   :  { %vm261_vm7 = vmor %vm259_vm6, %vm260_vm5 }
 0x24c   :  { %v635_v11 = vadd.f32 -1.0, %v269_v10  ;;  %v256_v32 = vsub.f32 1.0, %v255_v31  ;;  %v402_v10 = vld [vmem:[#allocation4 + $0x148] sm:$0xff] }
 0x24d   :  { %450 = vmatpush.msra.mxu0 %v402_v10 }
 0x24e   :  { %272 = vrot.lane.b32.xlu0 %v635_v11, %s755_s14  ;;  %v257_v33 = vmul.f32 %v674_v30, %v256_v32  ;;  %v399_v11 = vld [vmem:[#allocation4 + $0x130] sm:$0xff] }
 0x24f   :  { %451 = vmatpush.msra.mxu0 %v400_v12 }
 0x250   :  { %v258_v36 = vadd.f32 %v674_v30, %v257_v33 }
 0x251   :  { %452 = vmatpush.msra.mxu0 %v398_v14 }
 0x252   :  { %v262_v39 = vsel %vm261_vm7, %v674_v30, %v258_v36 }
 0x253   :  { %v267_v42 = vsel %vm264_vm8, %v266_v40, %v262_v39  ;;  %453 = vmatpush.msra.mxu0 %v396_v17  ;;  %v514_v40 = vld [vmem:[#allocation2 + $0xf8] sm:$0xff] }
 0x254   :  { %531 = vmatpush.msra.mxu1 %v514_v40 }
 0x255   :  { %454 = vmatpush.msra.mxu0 %v394_v19 }
 0x2c0   :  { %v273_v34 = vpop.permute.xlu0 %272 }
 0x2c1   :  { %v275_v35 = vmul.f32 %v273_v34, %v252_v9  ;;  %v401_v9 = vld [vmem:[#allocation4 + $0x140] sm:$0xff] }
 0x2c2   :  { %430 = vmatpush.msrb.mxu3 %v401_v9 }
 0x2c3   :  { %675 = vtanh.f32 %v275_v35  ;;  %v642_v35 = vld [vmem:[%s845_s4 + $0x4] sm:$0x3] }
 0x2c4   :  { %431 = vmatpush.msrb.mxu3 %v399_v11  ;;  %v412_v36 = vperm.slane %v642_v35, 0 }
 0x2c6   :  { %432 = vmatpush.msrb.mxu3 %v397_v13 }
 0x2c8   :  { %433 = vmatpush.msrb.mxu3 %v395_v16 }
 0x2c9   :  { %v676_v41 = vpop.eup %675 }
 0x2ca   :  { %v277_v43 = vmul.f32 %v676_v41, %v267_v42  ;;  %434 = vmatpush.msrb.mxu3 %v393_v18  ;;  %v513_v41 = vld [vmem:[#allocation2 + $0xf0] sm:$0xff] }
 0x2cb   :  { %532 = vmatpush.msra.mxu1 %v513_v41 }
 0x2cc   :  { %637 = vmatmul.msk.f32.vlgmr.msrb.gmra.mxu1 %vm65_vm0, %v277_v43  ;;  %638 = vmatmul.msk.f32.vlgmr.msrb.gmra.mxu2 %vm65_vm0, %v277_v43 }
 0x349   :  { %v322_v46 = vpop.f32.mrf.mxu1 }
 0x34a   :  { %v323_v47 = vadd.f32 %v322_v46, %v298_v45 }
 0x34c   :  { %v639_v48 = vmul.f32 -1.442695, %v323_v47 }
 0x34e   :  { %677 = vpow2.f32 %v639_v48 }
 0x34f   :  { %v342_v4 = vpop.f32.mrf.mxu2 }
 0x350   :  { %v343_v5 = vadd.f32 %v342_v4, %v299_v3  ;;  %v507_v3 = vld [vmem:[#allocation2 + $0xc0] sm:$0xff]  ;;  %v552_v4 = vld [vmem:[#allocation2 + $0x138] sm:$0xff] }
 0x351   :  { %569 = vmatpush.msra.mxu2 %v552_v4 }
 0x352   :  { %v640_v6 = vmul.f32 -1.442695, %v343_v5  ;;  %v551_v5 = vld [vmem:[#allocation2 + $0x130] sm:$0xff] }
 0x353   :  { %570 = vmatpush.msra.mxu2 %v551_v5 }
 0x354   :  { %v678_v53 = vpop.eup %677 }
 0x355   :  { %v351_v54 = vadd.f32 1.0, %v678_v53 }
 0x357   :  { %679 = vrcp.f32 %v351_v54  ;;  %v364_v58 = vand.u32 2147483648, %v351_v54  ;;  %v362_v60 = vand.u32 2147483647, %v351_v54  ;;  %vm358_vm10 = vweird.f32 %v351_v54 }
 0x358   :  { %681 = vpow2.f32 %v640_v6  ;;  %v550_v6 = vld [vmem:[#allocation2 + $0x128] sm:$0xff] }
 0x359   :  { %v365_v62 = vor.u32 1.1754944e-38, %v364_v58  ;;  %vm363_vm12 = vcmp.eq.f32.partialorder %v362_v60, 8.507059e+37  ;;  %v512_v60 = vld [vmem:[#allocation2 + $0xe8] sm:$0xff]  ;;  %571 = vmatpush.msra.mxu2 %v550_v6 }
 0x35a   :  { %533 = vmatpush.msra.mxu1 %v512_v60 }
 0x35b   :  { %572 = vmatpush.msra.mxu2 %v549_v7 }
 0x35d   :  { %v680_v55 = vpop.eup %679  ;;  %573 = vmatpush.msra.mxu2 %v548_v8 }
 0x35e   :  { %v354_v56 = vmul.f32 %v680_v55, %v351_v54  ;;  %vm359_vm9 = vweird.f32 %v680_v55  ;;  %v682_v15 = vpop.eup %681 }
 0x35f   :  { %vm360_vm11 = vmor %vm358_vm10, %vm359_vm9  ;;  %v352_v20 = vadd.f32 1.0, %v682_v15 }
 0x360   :  { %v355_v57 = vsub.f32 1.0, %v354_v56  ;;  %v413_v56 = vperm.slane %v642_v35, 1  ;;  %v585_v35 = vld [vmem:[#allocation2 + $0x150] sm:$0xff] }
 0x361   :  { %683 = vrcp.f32 %v352_v20  ;;  %v379_v28 = vand.u32 2147483648, %v352_v20  ;;  %vm373_vm14 = vweird.f32 %v352_v20  ;;  %v377_v29 = vand.u32 2147483647, %v352_v20 }
 0x362   :  { %v356_v59 = vmul.f32 %v680_v55, %v355_v57 }
 0x363   :  { %v380_v31 = vor.u32 1.1754944e-38, %v379_v28  ;;  %vm378_vm1 = vcmp.eq.f32.partialorder %v377_v29, 8.507059e+37  ;;  %v588_v28 = vld [vmem:[#allocation2 + $0x168] sm:$0xff]  ;;  %v587_v29 = vld [vmem:[#allocation2 + $0x160] sm:$0xff] }
 0x364   :  { %v357_v61 = vadd.f32 %v680_v55, %v356_v59 }
 0x366   :  { %v361_v63 = vsel %vm360_vm11, %v680_v55, %v357_v61  ;;  %v511_v61 = vld [vmem:[#allocation2 + $0xe0] sm:$0xff] }
 0x367   :  { %v366_v0 = vsel %vm363_vm12, %v365_v62, %v361_v63  ;;  %v684_v21 = vpop.eup %683  ;;  %534 = vmatpush.msra.mxu1 %v511_v61  ;;  %v510_v62 = vld [vmem:[#allocation2 + $0xd8] sm:$0xff] }
 0x368   :  { %v383_v1 = vmul.f32 2.0, %v366_v0  ;;  %v369_v22 = vmul.f32 %v684_v21, %v352_v20  ;;  %vm374_vm13 = vweird.f32 %v684_v21 }
 0x369   :  { %vm375_vm15 = vmor %vm373_vm14, %vm374_vm13  ;;  %535 = vmatpush.msra.mxu1 %v510_v62 }
 0x36a   :  { %v641_v2 = vadd.f32 -1.0, %v383_v1  ;;  %v370_v23 = vsub.f32 1.0, %v369_v22  ;;  %v508_v1 = vld [vmem:[#allocation2 + $0xc8] sm:$0xff] }
 0x36c   :  { %386 = vrot.lane.b32.xlu0 %v641_v2, %s755_s14  ;;  %v371_v24 = vmul.f32 %v684_v21, %v370_v23  ;;  %v547_v23 = vld [vmem:[#allocation2 + $0x110] sm:$0xff] }
 0x36d   :  { %574 = vmatpush.msra.mxu2 %v547_v23 }
 0x36e   :  { %v372_v27 = vadd.f32 %v684_v21, %v371_v24  ;;  %v546_v24 = vld [vmem:[#allocation2 + $0x108] sm:$0xff] }
 0x36f   :  { %575 = vmatpush.msra.mxu2 %v546_v24 }
 0x370   :  { %v376_v30 = vsel %vm375_vm15, %v684_v21, %v372_v27  ;;  %v589_v27 = vld [vmem:[#allocation2 + $0x170] sm:$0xff] }
 0x371   :  { %v381_v33 = vsel %vm378_vm1, %v380_v31, %v376_v30  ;;  %v586_v30 = vld [vmem:[#allocation2 + $0x158] sm:$0xff]  ;;  %v664_v31 = vld [vmem:[%s843_s2 + $0x3] ss:$0 sm:$0xff] }
 0x3de   :  { %v387_v25 = vpop.permute.xlu0 %386 }
 0x3df   :  { %v389_v26 = vmul.f32 %v387_v25, %v366_v0  ;;  %v509_v0 = vld [vmem:[#allocation2 + $0xd0] sm:$0xff]  ;;  %v545_v25 = vld [vmem:[#allocation2 + $0x100] sm:$0xff] }
 0x3e0   :  { %536 = vmatpush.msra.mxu1 %v509_v0  ;;  %576 = vmatpush.msra.mxu2 %v545_v25 }
 0x3e1   :  { %685 = vtanh.f32 %v389_v26  ;;  %v590_v26 = vld [vmem:[#allocation2 + $0x178] sm:$0xff] }
 0x3e2   :  { %537 = vmatpush.msra.mxu1 %v508_v1  ;;  %607 = vmatpush.msra.mxu3 %v590_v26 }
 0x3e4   :  { %538 = vmatpush.msra.mxu1 %v507_v3  ;;  %608 = vmatpush.msra.mxu3 %v589_v27 }
 0x3e6   :  { %609 = vmatpush.msra.mxu3 %v588_v28 }
 0x3e7   :  { %v686_v32 = vpop.eup %685 }
 0x3e8   :  { %v391_v34 = vmul.f32 %v686_v32, %v381_v33  ;;  %610 = vmatpush.msra.mxu3 %v587_v29 }
 0x3ea   :  { %643 = vmatmul.msk.f32.vlgmr.msrb.gmra.mxu3 %vm65_vm0, %v391_v34  ;;  %644 = vmatmul.msk.f32.vlgmr.msra.gmra.mxu0 %vm65_vm0, %v391_v34 }
 0x3eb   :  { %611 = vmatpush.msra.mxu3 %v586_v30 }
 0x3ed   :  { %612 = vmatpush.msra.mxu3 %v585_v35 }
 0x467   :  { %v456_v57 = vpop.f32.mrf.mxu0 }
 0x468   :  { %v457_v58 = vadd.f32 %v456_v57, %v413_v56 }
 0x46a   :  { %v646_v59 = vmul.f32 -1.442695, %v457_v58 }
 0x46d   :  { %v436_v37 = vpop.f32.mrf.mxu3 }
 0x46e   :  { %v437_v38 = vadd.f32 %v436_v37, %v412_v36  ;;  %v584_v36 = vld [vmem:[#allocation2 + $0x148] sm:$0xff]  ;;  %v583_v37 = vld [vmem:[#allocation2 + $0x140] sm:$0xff] }
 0x46f   :  { %613 = vmatpush.msra.mxu3 %v584_v36 }
 0x470   :  { %v645_v39 = vmul.f32 -1.442695, %v437_v38  ;;  %v665_v38 = vld [vmem:[%s843_s2 + $0x4] ss:$0 sm:$0xff] }
 0x471   :  { %614 = vmatpush.msra.mxu3 %v583_v37 }
 0x472   :  { %687 = vpow2.f32 %v645_v39 }
 0x478   :  { %v688_v42 = vpop.eup %687 }
 0x479   :  { %v465_v43 = vadd.f32 1.0, %v688_v42  ;;  %v666_v42 = vld [vmem:[%s843_s2 + $0x5] ss:$0 sm:$0xff] }
 0x47b   :  { %689 = vrcp.f32 %v465_v43  ;;  %v478_v47 = vand.u32 2147483648, %v465_v43  ;;  %v476_v49 = vand.u32 2147483647, %v465_v43  ;;  %vm472_vm3 = vweird.f32 %v465_v43 }
 0x47c   :  { %691 = vpow2.f32 %v646_v59 }
 0x47d   :  { %v479_v51 = vor.u32 1.1754944e-38, %v478_v47  ;;  %vm477_vm5 = vcmp.eq.f32.partialorder %v476_v49, 8.507059e+37 }
 0x481   :  { %v690_v44 = vpop.eup %689 }
 0x482   :  { %v468_v45 = vmul.f32 %v690_v44, %v465_v43  ;;  %vm473_vm2 = vweird.f32 %v690_v44  ;;  %v692_v63 = vpop.eup %691 }
 0x483   :  { %vm474_vm4 = vmor %vm472_vm3, %vm473_vm2  ;;  %v466_v2 = vadd.f32 1.0, %v692_v63 }
 0x484   :  { %v469_v46 = vsub.f32 1.0, %v468_v45 }
 0x485   :  { %693 = vrcp.f32 %v466_v2  ;;  %v493_v16 = vand.u32 2147483648, %v466_v2  ;;  %vm487_vm7 = vweird.f32 %v466_v2  ;;  %v491_v17 = vand.u32 2147483647, %v466_v2 }
 0x486   :  { %v470_v48 = vmul.f32 %v690_v44, %v469_v46 }
 0x487   :  { %v494_v19 = vor.u32 1.1754944e-38, %v493_v16  ;;  %vm492_vm9 = vcmp.eq.f32.partialorder %v491_v17, 8.507059e+37 }
 0x488   :  { %v471_v50 = vadd.f32 %v690_v44, %v470_v48 }
 0x48a   :  { %v475_v52 = vsel %vm474_vm4, %v690_v44, %v471_v50 }
 0x48b   :  { %v480_v53 = vsel %vm477_vm5, %v479_v51, %v475_v52  ;;  %v694_v9 = vpop.eup %693 }
 0x48c   :  { %v497_v54 = vmul.f32 2.0, %v480_v53  ;;  %v483_v10 = vmul.f32 %v694_v9, %v466_v2  ;;  %vm488_vm6 = vweird.f32 %v694_v9 }
 0x48d   :  { %vm489_vm8 = vmor %vm487_vm7, %vm488_vm6 }
 0x48e   :  { %v647_v55 = vadd.f32 -1.0, %v497_v54  ;;  %v484_v11 = vsub.f32 1.0, %v483_v10 }
 0x490   :  { %500 = vrot.lane.b32.xlu1 %v647_v55, %s755_s14  ;;  %v485_v12 = vmul.f32 %v694_v9, %v484_v11 }
 0x492   :  { %v486_v15 = vadd.f32 %v694_v9, %v485_v12 }
 0x494   :  { %v490_v18 = vsel %vm489_vm8, %v694_v9, %v486_v15 }
 0x495   :  { %v495_v21 = vsel %vm492_vm9, %v494_v19, %v490_v18 }
 0x502   :  { %v501_v13 = vpop.permute.xlu1 %500 }
 0x503   :  { %v503_v14 = vmul.f32 %v501_v13, %v480_v53 }
 0x505   :  { %695 = vtanh.f32 %v503_v14 }
 0x50b   :  { %v696_v20 = vpop.eup %695 }
 0x50c   :  { %v505_v22 = vmul.f32 %v696_v20, %v495_v21 }
 0x50e   :  { %649 = vmatmul.msk.f32.vlgmr.msra.gmra.mxu1 %vm65_vm0, %v505_v22 }
 0x58b   :  { %v540_v32 = vpop.f32.mrf.mxu1 }
 0x58c   :  { %v541_v33 = vadd.f32 %v664_v31, %v540_v32 }
 0x58e   :  { %v543_v34 = vmax.f32 %v541_v33, 0.0 }
 0x590   :  { %651 = vmatmul.msk.f32.vlgmr.msra.gmra.mxu2 %vm65_vm0, %v543_v34 }
 0x613   :  { %v578_v39 = vpop.f32.mrf.mxu2 }
 0x614   :  { %v579_v40 = vadd.f32 %v665_v38, %v578_v39 }
 0x616   :  { %v581_v41 = vmax.f32 %v579_v40, 0.0 }
 0x618   :  { %653 = vmatmul.msk.f32.vlgmr.msra.gmra.mxu3 %vm65_vm0, %v581_v41 }
 0x69b   :  { %v616_v43 = vpop.f32.mrf.mxu3 }
 0x69c   :  { %v617_v44 = vadd.f32 %v666_v42, %v616_v43 }
 0x69e   :  { %619 = vst.msk [vmem:[%s846_s5] sm:$0xff] %vm65_vm0, %v617_v44 }
 0x69f   :  { %624 = vsyncpa [#allocation3], 1 }
 0x6a0   :  { %625 = vsyncpa [#allocation5], 1 }

</bundles_post_ra>
